<compile_context>
chip_gen: v7x
topology: tpu7x:2x2x1
jax: 0.10.0
libtpu: 0.0.40
codegen_flags: <defaults>
</compile_context>

<pallas_src>
import functools

import jax
import jax.numpy as jnp
from jax import lax
from jax.experimental import pallas as pl
from jax.experimental.pallas import tpu as pltpu


_LANES = 128


def _dce_kernel(w_ref, logits_ref, labels_ref, out_ref, *,
                num_heads, num_classes, chunk_sublanes):
    """One grid cell: all K heads, all C classes, one lane-dense pixel tile.

    logits_ref: (K, C, TS, 128) float     labels_ref: (TS, 128) int32
    w_ref:      (K,) f32 in SMEM (already scaled by 1/total_pixels)
    out_ref:    (8, 128) f32 per-cell partial (broadcast scalar)
    """
    ts = labels_ref.shape[0]
    cs = chunk_sublanes
    n_chunks = ts // cs

    # Hoist the SMEM scalar weight loads out of the pixel loop.
    ws = [w_ref[k] for k in range(num_heads)]

    def chunk_body(i, acc):
        s = pl.multiple_of(i * cs, cs)
        lbl = labels_ref[pl.ds(s, cs), :]                        # (CS, 128) i32
        valid = lbl >= 0                                         # padded pixels -> False
        masks = [lbl == c for c in range(num_classes)]           # reused across heads

        chunk_loss = jnp.zeros((cs, _LANES), jnp.float32)
        for k in range(num_heads):                               # K small: static unroll
            xs = [logits_ref[k, c, pl.ds(s, cs), :].astype(jnp.float32)
                  for c in range(num_classes)]
            m = xs[0]
            for c in range(1, num_classes):                      # running max (VPU)
                m = jnp.maximum(m, xs[c])
            se = jnp.zeros((cs, _LANES), jnp.float32)
            picked = jnp.zeros((cs, _LANES), jnp.float32)
            for c in range(num_classes):
                se = se + jnp.exp(xs[c] - m)                     # EUP
                picked = picked + jnp.where(masks[c], xs[c], 0.0)
            lse = m + jnp.log(se)
            chunk_loss = chunk_loss + ws[k] * (lse - picked)     # weight already has 1/P

        return acc + jnp.where(valid, chunk_loss, 0.0)

    acc = lax.fori_loop(0, n_chunks, chunk_body,
                        jnp.zeros((cs, _LANES), jnp.float32),
                        unroll=min(2, n_chunks))

    # Lane-dense, unmasked (8,128) store; wrapper reads element [0, 0] per cell.
    out_ref[...] = jnp.zeros((8, _LANES), jnp.float32) + jnp.sum(acc)


def _vmem_capacity_bytes():
    """Best-effort per-TensorCore VMEM size at trace time (generation-aware)."""
    try:
        info = pltpu.get_tpu_info()
        for attr in ("vmem_capacity_bytes", "vmem_size_bytes", "vmem_bytes"):
            v = getattr(info, attr, None)
            if v:
                return int(v)
    except Exception:
        pass
    return 64 * 1024 * 1024          # conservative default = v7x per-TC VMEM


def _round_up(x, m):
    return -(-x // m) * m


def _pick_pixel_tile(hw, n, bytes_per_pixel, granule, block_budget_bytes):
    """Pick TP (pixels per grid cell), a multiple of `granule`, so that one
    (logits + labels) block fits `block_budget_bytes` and the grid has >= 2
    cells (v7x megacore) whenever the problem is big enough to split."""
    cap = max(granule, (block_budget_bytes // bytes_per_pixel) // granule * granule)
    tp = min(cap, _round_up(hw, granule))
    nt = -(-hw // tp)
    while n * nt < 2 and tp > granule:     # keep both v7x TensorCores busy
        tp = max(granule, ((tp // 2) // granule) * granule)
        nt = -(-hw // tp)
    return tp, nt


def deep_cross_entropy(y_preds, y_true, weights):
    """y_preds: (K, N, C, H, W) logits (or list/tuple of K (N,C,H,W) arrays);
    y_true: (N, H, W) int class labels; weights: (K,) head weights.
    Returns the scalar weighted deep-supervision cross-entropy loss.

    Precondition: all labels are valid class ids in [0, C).
    """
    # TODO(synk): PyTorch CrossEntropyLoss ignore_index=-100 semantics (mean over
    # valid targets) are not implemented; negative labels are zeroed out but the
    # normalization stays 1/(N*H*W), matching the module's actual (all-valid) use.
    if isinstance(y_preds, (list, tuple)):
        y_preds = jnp.stack(y_preds)
    K, N, C, H, W = y_preds.shape
    HW = H * W
    P = N * HW

    # Keep bf16 logits as bf16 (halves the HBM read that dominates on v5e/v6e);
    # anything else is promoted to f32.  Upcast to f32 happens inside the kernel.
    if y_preds.dtype not in (jnp.float32, jnp.bfloat16):
        y_preds = y_preds.astype(jnp.float32)
    itemsize = y_preds.dtype.itemsize

    # Sublane granule so the trailing (TP/128, 128) block obeys native
    # (8,128) f32 / (16,128) bf16 tiling.
    gran_sub = 8 if itemsize == 4 else 16
    granule = gran_sub * _LANES

    # Generation-aware VMEM budgeting (v7x: 64 MiB physical; v5e/v6e: 128 MiB).
    vmem_cap = _vmem_capacity_bytes()
    vmem_limit = min(vmem_cap // 2, 64 * 1024 * 1024)        # 32 MiB on v7x, 64 MiB else
    block_budget = min(vmem_limit // 3, 16 * 1024 * 1024)    # per buffer; x2 double-buffered

    bytes_per_pixel = K * C * itemsize + 4                   # logits + int32 label
    TP, nt = _pick_pixel_tile(HW, N, bytes_per_pixel, granule, block_budget)
    HW_pad = nt * TP
    TS = TP // _LANES

    logits = y_preds.reshape(K, N, C, HW)                    # free reshape, no transpose
    labels = y_true.reshape(N, HW).astype(jnp.int32)
    if HW_pad != HW:
        # TODO(synk): padding costs one extra HBM pass over the logits; only hit
        # when H*W is not already a multiple of the pixel tile.
        pad = HW_pad - HW
        logits = jnp.pad(logits, ((0, 0), (0, 0), (0, 0), (0, pad)))
        labels = jnp.pad(labels, ((0, 0), (0, pad)), constant_values=-1)
    logits = logits.reshape(K, N, C, HW_pad // _LANES, _LANES)
    labels = labels.reshape(N, HW_pad // _LANES, _LANES)

    w_scaled = jnp.asarray(weights, jnp.float32).reshape(K) / jnp.float32(P)

    kernel = functools.partial(_dce_kernel, num_heads=K, num_classes=C,
                               chunk_sublanes=gran_sub)

    cost = pl.CostEstimate(
        flops=6 * K * P * C,
        transcendentals=K * P * (C + 1),
        bytes_accessed=(logits.size * itemsize + labels.size * 4
                        + N * nt * 8 * _LANES * 4),
    )

    partials = pl.pallas_call(
        kernel,
        out_shape=jax.ShapeDtypeStruct((N, nt, 8, _LANES), jnp.float32),
        grid_spec=pltpu.PrefetchScalarGridSpec(
            num_scalar_prefetch=1,                           # scaled weights -> SMEM
            grid=(N, nt),
            in_specs=[
                # all heads, all classes, one lane-dense pixel tile
                pl.BlockSpec((K, None, C, TS, _LANES),
                             lambda n, t, w: (0, n, 0, t, 0)),
                pl.BlockSpec((None, TS, _LANES), lambda n, t, w: (n, t, 0)),
            ],
            out_specs=pl.BlockSpec((None, None, 8, _LANES),
                                   lambda n, t, w: (n, t, 0, 0)),
        ),
        compiler_params=pltpu.CompilerParams(
            dimension_semantics=("parallel", "parallel"),
            vmem_limit_bytes=vmem_limit,
        ),
        cost_estimate=cost,
    )(w_scaled, logits, labels)

    # Tiny final reduction over per-cell partials in plain JAX.
    return jnp.sum(partials[:, :, 0, 0])


def _reference(y_preds, y_true, weights):
    K, N, C, H, W = y_preds.shape
    logits = jnp.transpose(y_preds, (0, 1, 3, 4, 2)).reshape(K, -1, C)
    labels = y_true.reshape(-1)
    logp = jax.nn.log_softmax(logits.astype(jnp.float32), axis=-1)
    per_pix = -jnp.take_along_axis(logp, labels[None, :, None], axis=-1)[..., 0]
    per_head = jnp.mean(per_pix, axis=-1)                    # CrossEntropyLoss (mean) per head
    return jnp.sum(jnp.asarray(weights, jnp.float32) * per_head)


if __name__ == "__main__":
    key = jax.random.PRNGKey(0)
    K, N, C, H, W = 3, 2, 4, 16, 16                          # 3 deep-supervision heads, 4 classes

    k1, k2 = jax.random.split(key)
    y_preds = jax.random.normal(k1, (K, N, C, H, W), dtype=jnp.float32)
    y_true = jax.random.randint(k2, (N, H, W), 0, C, dtype=jnp.int32)
    head_weights = jnp.array([0.5, 0.3, 0.2], dtype=jnp.float32)

    loss = deep_cross_entropy(y_preds, y_true, head_weights)
    loss = jax.block_until_ready(loss)

    ref = _reference(y_preds, y_true, head_weights)
    assert jnp.allclose(loss, ref, rtol=1e-5, atol=1e-5), (loss, ref)

    print("KERNEL_OK")
</pallas_src>

<mosaic_0001>
module attributes {stable_mosaic.version = 11 : i64} {
  func.func @_dce_kernel(%arg0: i32, %arg1: i32, %arg2: memref<3xf32, #tpu.memory_space<smem>>, %arg3: memref<3x1x4x8x128xf32, #tpu.memory_space<vmem>>, %arg4: memref<1x8x128xi32, #tpu.memory_space<vmem>>, %arg5: memref<1x1x8x128xf32, #tpu.memory_space<vmem>>) attributes {dimension_semantics = [#tpu.dimension_semantics<parallel>, #tpu.dimension_semantics<parallel>], iteration_bounds = array<i64: 2, 1>, scalar_prefetch = 1 : i64, scratch_operands = 0 : i64, tpu.core_type = #tpu.core_type<tc>, window_params = [{transform_indices = @transform_0, window_bounds = array<i64: 3, 1, 4, 8, 128>}, {transform_indices = @transform_1, window_bounds = array<i64: 1, 8, 128>}, {transform_indices = @transform_2, window_bounds = array<i64: 1, 1, 8, 128>}]} {
    %c0 = arith.constant 0 : index
    %0 = memref.load %arg2[%c0] : memref<3xf32, #tpu.memory_space<smem>>
    %c1 = arith.constant 1 : index
    %1 = memref.load %arg2[%c1] : memref<3xf32, #tpu.memory_space<smem>>
    %c2 = arith.constant 2 : index
    %2 = memref.load %arg2[%c2] : memref<3xf32, #tpu.memory_space<smem>>
    %cst = arith.constant 0.000000e+00 : f32
    %3 = vector.broadcast %cst : f32 to vector<8x128xf32>
    %c0_i32 = arith.constant 0 : i32
    %c8_i32 = arith.constant 8 : i32
    %4 = arith.muli %c0_i32, %c8_i32 : i32
    %5 = tpu.assume_multiple %4, 8 : i32
    %c0_0 = arith.constant 0 : index
    %6 = arith.index_cast %5 : i32 to index
    %c0_1 = arith.constant 0 : index
    %7 = vector.load %arg4[%c0_0, %6, %c0_1] : memref<1x8x128xi32, #tpu.memory_space<vmem>>, vector<1x8x128xi32>
    %8 = vector.shape_cast %7 : vector<1x8x128xi32> to vector<8x128xi32>
    %c0_i32_2 = arith.constant 0 : i32
    %9 = vector.broadcast %c0_i32_2 : i32 to vector<8x128xi32>
    %10 = arith.cmpi sge, %8, %9 : vector<8x128xi32>
    %c0_i32_3 = arith.constant 0 : i32
    %11 = vector.broadcast %c0_i32_3 : i32 to vector<8x128xi32>
    %12 = arith.cmpi eq, %8, %11 : vector<8x128xi32>
    %c1_i32 = arith.constant 1 : i32
    %13 = vector.broadcast %c1_i32 : i32 to vector<8x128xi32>
    %14 = arith.cmpi eq, %8, %13 : vector<8x128xi32>
    %c2_i32 = arith.constant 2 : i32
    %15 = vector.broadcast %c2_i32 : i32 to vector<8x128xi32>
    %16 = arith.cmpi eq, %8, %15 : vector<8x128xi32>
    %c3_i32 = arith.constant 3 : i32
    %17 = vector.broadcast %c3_i32 : i32 to vector<8x128xi32>
    %18 = arith.cmpi eq, %8, %17 : vector<8x128xi32>
    %cst_4 = arith.constant 0.000000e+00 : f32
    %19 = vector.broadcast %cst_4 : f32 to vector<8x128xf32>
    %c0_5 = arith.constant 0 : index
    %c0_6 = arith.constant 0 : index
    %c0_7 = arith.constant 0 : index
    %20 = arith.index_cast %5 : i32 to index
    %c0_8 = arith.constant 0 : index
    %21 = vector.load %arg3[%c0_5, %c0_6, %c0_7, %20, %c0_8] : memref<3x1x4x8x128xf32, #tpu.memory_space<vmem>>, vector<1x1x1x8x128xf32>
    %22 = vector.shape_cast %21 : vector<1x1x1x8x128xf32> to vector<8x128xf32>
    %c0_9 = arith.constant 0 : index
    %c0_10 = arith.constant 0 : index
    %c1_11 = arith.constant 1 : index
    %23 = arith.index_cast %5 : i32 to index
    %c0_12 = arith.constant 0 : index
    %24 = vector.load %arg3[%c0_9, %c0_10, %c1_11, %23, %c0_12] : memref<3x1x4x8x128xf32, #tpu.memory_space<vmem>>, vector<1x1x1x8x128xf32>
    %25 = vector.shape_cast %24 : vector<1x1x1x8x128xf32> to vector<8x128xf32>
    %c0_13 = arith.constant 0 : index
    %c0_14 = arith.constant 0 : index
    %c2_15 = arith.constant 2 : index
    %26 = arith.index_cast %5 : i32 to index
    %c0_16 = arith.constant 0 : index
    %27 = vector.load %arg3[%c0_13, %c0_14, %c2_15, %26, %c0_16] : memref<3x1x4x8x128xf32, #tpu.memory_space<vmem>>, vector<1x1x1x8x128xf32>
    %28 = vector.shape_cast %27 : vector<1x1x1x8x128xf32> to vector<8x128xf32>
    %c0_17 = arith.constant 0 : index
    %c0_18 = arith.constant 0 : index
    %c3 = arith.constant 3 : index
    %29 = arith.index_cast %5 : i32 to index
    %c0_19 = arith.constant 0 : index
    %30 = vector.load %arg3[%c0_17, %c0_18, %c3, %29, %c0_19] : memref<3x1x4x8x128xf32, #tpu.memory_space<vmem>>, vector<1x1x1x8x128xf32>
    %31 = vector.shape_cast %30 : vector<1x1x1x8x128xf32> to vector<8x128xf32>
    %32 = arith.maximumf %22, %25 : vector<8x128xf32>
    %33 = arith.maximumf %32, %28 : vector<8x128xf32>
    %34 = arith.maximumf %33, %31 : vector<8x128xf32>
    %cst_20 = arith.constant 0.000000e+00 : f32
    %35 = vector.broadcast %cst_20 : f32 to vector<8x128xf32>
    %cst_21 = arith.constant 0.000000e+00 : f32
    %36 = vector.broadcast %cst_21 : f32 to vector<8x128xf32>
    %37 = arith.subf %22, %34 : vector<8x128xf32>
    %38 = math.exp %37 : vector<8x128xf32>
    %39 = arith.addf %35, %38 : vector<8x128xf32>
    %cst_22 = arith.constant 0.000000e+00 : f32
    %40 = vector.broadcast %cst_22 : f32 to vector<8x128xf32>
    %41 = arith.select %12, %22, %40 : vector<8x128xi1>, vector<8x128xf32>
    %42 = arith.addf %36, %41 : vector<8x128xf32>
    %43 = arith.subf %25, %34 : vector<8x128xf32>
    %44 = math.exp %43 : vector<8x128xf32>
    %45 = arith.addf %39, %44 : vector<8x128xf32>
    %cst_23 = arith.constant 0.000000e+00 : f32
    %46 = vector.broadcast %cst_23 : f32 to vector<8x128xf32>
    %47 = arith.select %14, %25, %46 : vector<8x128xi1>, vector<8x128xf32>
    %48 = arith.addf %42, %47 : vector<8x128xf32>
    %49 = arith.subf %28, %34 : vector<8x128xf32>
    %50 = math.exp %49 : vector<8x128xf32>
    %51 = arith.addf %45, %50 : vector<8x128xf32>
    %cst_24 = arith.constant 0.000000e+00 : f32
    %52 = vector.broadcast %cst_24 : f32 to vector<8x128xf32>
    %53 = arith.select %16, %28, %52 : vector<8x128xi1>, vector<8x128xf32>
    %54 = arith.addf %48, %53 : vector<8x128xf32>
    %55 = arith.subf %31, %34 : vector<8x128xf32>
    %56 = math.exp %55 : vector<8x128xf32>
    %57 = arith.addf %51, %56 : vector<8x128xf32>
    %cst_25 = arith.constant 0.000000e+00 : f32
    %58 = vector.broadcast %cst_25 : f32 to vector<8x128xf32>
    %59 = arith.select %18, %31, %58 : vector<8x128xi1>, vector<8x128xf32>
    %60 = arith.addf %54, %59 : vector<8x128xf32>
    %61 = math.log %57 : vector<8x128xf32>
    %62 = arith.addf %34, %61 : vector<8x128xf32>
    %63 = arith.subf %62, %60 : vector<8x128xf32>
    %64 = vector.broadcast %0 : f32 to vector<8x128xf32>
    %65 = arith.mulf %64, %63 : vector<8x128xf32>
    %66 = arith.addf %19, %65 : vector<8x128xf32>
    %c1_26 = arith.constant 1 : index
    %c0_27 = arith.constant 0 : index
    %c0_28 = arith.constant 0 : index
    %67 = arith.index_cast %5 : i32 to index
    %c0_29 = arith.constant 0 : index
    %68 = vector.load %arg3[%c1_26, %c0_27, %c0_28, %67, %c0_29] : memref<3x1x4x8x128xf32, #tpu.memory_space<vmem>>, vector<1x1x1x8x128xf32>
    %69 = vector.shape_cast %68 : vector<1x1x1x8x128xf32> to vector<8x128xf32>
    %c1_30 = arith.constant 1 : index
    %c0_31 = arith.constant 0 : index
    %c1_32 = arith.constant 1 : index
    %70 = arith.index_cast %5 : i32 to index
    %c0_33 = arith.constant 0 : index
    %71 = vector.load %arg3[%c1_30, %c0_31, %c1_32, %70, %c0_33] : memref<3x1x4x8x128xf32, #tpu.memory_space<vmem>>, vector<1x1x1x8x128xf32>
    %72 = vector.shape_cast %71 : vector<1x1x1x8x128xf32> to vector<8x128xf32>
    %c1_34 = arith.constant 1 : index
    %c0_35 = arith.constant 0 : index
    %c2_36 = arith.constant 2 : index
    %73 = arith.index_cast %5 : i32 to index
    %c0_37 = arith.constant 0 : index
    %74 = vector.load %arg3[%c1_34, %c0_35, %c2_36, %73, %c0_37] : memref<3x1x4x8x128xf32, #tpu.memory_space<vmem>>, vector<1x1x1x8x128xf32>
    %75 = vector.shape_cast %74 : vector<1x1x1x8x128xf32> to vector<8x128xf32>
    %c1_38 = arith.constant 1 : index
    %c0_39 = arith.constant 0 : index
    %c3_40 = arith.constant 3 : index
    %76 = arith.index_cast %5 : i32 to index
    %c0_41 = arith.constant 0 : index
    %77 = vector.load %arg3[%c1_38, %c0_39, %c3_40, %76, %c0_41] : memref<3x1x4x8x128xf32, #tpu.memory_space<vmem>>, vector<1x1x1x8x128xf32>
    %78 = vector.shape_cast %77 : vector<1x1x1x8x128xf32> to vector<8x128xf32>
    %79 = arith.maximumf %69, %72 : vector<8x128xf32>
    %80 = arith.maximumf %79, %75 : vector<8x128xf32>
    %81 = arith.maximumf %80, %78 : vector<8x128xf32>
    %cst_42 = arith.constant 0.000000e+00 : f32
    %82 = vector.broadcast %cst_42 : f32 to vector<8x128xf32>
    %cst_43 = arith.constant 0.000000e+00 : f32
    %83 = vector.broadcast %cst_43 : f32 to vector<8x128xf32>
    %84 = arith.subf %69, %81 : vector<8x128xf32>
    %85 = math.exp %84 : vector<8x128xf32>
    %86 = arith.addf %82, %85 : vector<8x128xf32>
    %cst_44 = arith.constant 0.000000e+00 : f32
    %87 = vector.broadcast %cst_44 : f32 to vector<8x128xf32>
    %88 = arith.select %12, %69, %87 : vector<8x128xi1>, vector<8x128xf32>
    %89 = arith.addf %83, %88 : vector<8x128xf32>
    %90 = arith.subf %72, %81 : vector<8x128xf32>
    %91 = math.exp %90 : vector<8x128xf32>
    %92 = arith.addf %86, %91 : vector<8x128xf32>
    %cst_45 = arith.constant 0.000000e+00 : f32
    %93 = vector.broadcast %cst_45 : f32 to vector<8x128xf32>
    %94 = arith.select %14, %72, %93 : vector<8x128xi1>, vector<8x128xf32>
    %95 = arith.addf %89, %94 : vector<8x128xf32>
    %96 = arith.subf %75, %81 : vector<8x128xf32>
    %97 = math.exp %96 : vector<8x128xf32>
    %98 = arith.addf %92, %97 : vector<8x128xf32>
    %cst_46 = arith.constant 0.000000e+00 : f32
    %99 = vector.broadcast %cst_46 : f32 to vector<8x128xf32>
    %100 = arith.select %16, %75, %99 : vector<8x128xi1>, vector<8x128xf32>
    %101 = arith.addf %95, %100 : vector<8x128xf32>
    %102 = arith.subf %78, %81 : vector<8x128xf32>
    %103 = math.exp %102 : vector<8x128xf32>
    %104 = arith.addf %98, %103 : vector<8x128xf32>
    %cst_47 = arith.constant 0.000000e+00 : f32
    %105 = vector.broadcast %cst_47 : f32 to vector<8x128xf32>
    %106 = arith.select %18, %78, %105 : vector<8x128xi1>, vector<8x128xf32>
    %107 = arith.addf %101, %106 : vector<8x128xf32>
    %108 = math.log %104 : vector<8x128xf32>
    %109 = arith.addf %81, %108 : vector<8x128xf32>
    %110 = arith.subf %109, %107 : vector<8x128xf32>
    %111 = vector.broadcast %1 : f32 to vector<8x128xf32>
    %112 = arith.mulf %111, %110 : vector<8x128xf32>
    %113 = arith.addf %66, %112 : vector<8x128xf32>
    %c2_48 = arith.constant 2 : index
    %c0_49 = arith.constant 0 : index
    %c0_50 = arith.constant 0 : index
    %114 = arith.index_cast %5 : i32 to index
    %c0_51 = arith.constant 0 : index
    %115 = vector.load %arg3[%c2_48, %c0_49, %c0_50, %114, %c0_51] : memref<3x1x4x8x128xf32, #tpu.memory_space<vmem>>, vector<1x1x1x8x128xf32>
    %116 = vector.shape_cast %115 : vector<1x1x1x8x128xf32> to vector<8x128xf32>
    %c2_52 = arith.constant 2 : index
    %c0_53 = arith.constant 0 : index
    %c1_54 = arith.constant 1 : index
    %117 = arith.index_cast %5 : i32 to index
    %c0_55 = arith.constant 0 : index
    %118 = vector.load %arg3[%c2_52, %c0_53, %c1_54, %117, %c0_55] : memref<3x1x4x8x128xf32, #tpu.memory_space<vmem>>, vector<1x1x1x8x128xf32>
    %119 = vector.shape_cast %118 : vector<1x1x1x8x128xf32> to vector<8x128xf32>
    %c2_56 = arith.constant 2 : index
    %c0_57 = arith.constant 0 : index
    %c2_58 = arith.constant 2 : index
    %120 = arith.index_cast %5 : i32 to index
    %c0_59 = arith.constant 0 : index
    %121 = vector.load %arg3[%c2_56, %c0_57, %c2_58, %120, %c0_59] : memref<3x1x4x8x128xf32, #tpu.memory_space<vmem>>, vector<1x1x1x8x128xf32>
    %122 = vector.shape_cast %121 : vector<1x1x1x8x128xf32> to vector<8x128xf32>
    %c2_60 = arith.constant 2 : index
    %c0_61 = arith.constant 0 : index
    %c3_62 = arith.constant 3 : index
    %123 = arith.index_cast %5 : i32 to index
    %c0_63 = arith.constant 0 : index
    %124 = vector.load %arg3[%c2_60, %c0_61, %c3_62, %123, %c0_63] : memref<3x1x4x8x128xf32, #tpu.memory_space<vmem>>, vector<1x1x1x8x128xf32>
    %125 = vector.shape_cast %124 : vector<1x1x1x8x128xf32> to vector<8x128xf32>
    %126 = arith.maximumf %116, %119 : vector<8x128xf32>
    %127 = arith.maximumf %126, %122 : vector<8x128xf32>
    %128 = arith.maximumf %127, %125 : vector<8x128xf32>
    %cst_64 = arith.constant 0.000000e+00 : f32
    %129 = vector.broadcast %cst_64 : f32 to vector<8x128xf32>
    %cst_65 = arith.constant 0.000000e+00 : f32
    %130 = vector.broadcast %cst_65 : f32 to vector<8x128xf32>
    %131 = arith.subf %116, %128 : vector<8x128xf32>
    %132 = math.exp %131 : vector<8x128xf32>
    %133 = arith.addf %129, %132 : vector<8x128xf32>
    %cst_66 = arith.constant 0.000000e+00 : f32
    %134 = vector.broadcast %cst_66 : f32 to vector<8x128xf32>
    %135 = arith.select %12, %116, %134 : vector<8x128xi1>, vector<8x128xf32>
    %136 = arith.addf %130, %135 : vector<8x128xf32>
    %137 = arith.subf %119, %128 : vector<8x128xf32>
    %138 = math.exp %137 : vector<8x128xf32>
    %139 = arith.addf %133, %138 : vector<8x128xf32>
    %cst_67 = arith.constant 0.000000e+00 : f32
    %140 = vector.broadcast %cst_67 : f32 to vector<8x128xf32>
    %141 = arith.select %14, %119, %140 : vector<8x128xi1>, vector<8x128xf32>
    %142 = arith.addf %136, %141 : vector<8x128xf32>
    %143 = arith.subf %122, %128 : vector<8x128xf32>
    %144 = math.exp %143 : vector<8x128xf32>
    %145 = arith.addf %139, %144 : vector<8x128xf32>
    %cst_68 = arith.constant 0.000000e+00 : f32
    %146 = vector.broadcast %cst_68 : f32 to vector<8x128xf32>
    %147 = arith.select %16, %122, %146 : vector<8x128xi1>, vector<8x128xf32>
    %148 = arith.addf %142, %147 : vector<8x128xf32>
    %149 = arith.subf %125, %128 : vector<8x128xf32>
    %150 = math.exp %149 : vector<8x128xf32>
    %151 = arith.addf %145, %150 : vector<8x128xf32>
    %cst_69 = arith.constant 0.000000e+00 : f32
    %152 = vector.broadcast %cst_69 : f32 to vector<8x128xf32>
    %153 = arith.select %18, %125, %152 : vector<8x128xi1>, vector<8x128xf32>
    %154 = arith.addf %148, %153 : vector<8x128xf32>
    %155 = math.log %151 : vector<8x128xf32>
    %156 = arith.addf %128, %155 : vector<8x128xf32>
    %157 = arith.subf %156, %154 : vector<8x128xf32>
    %158 = vector.broadcast %2 : f32 to vector<8x128xf32>
    %159 = arith.mulf %158, %157 : vector<8x128xf32>
    %160 = arith.addf %113, %159 : vector<8x128xf32>
    %cst_70 = arith.constant 0.000000e+00 : f32
    %161 = vector.broadcast %cst_70 : f32 to vector<8x128xf32>
    %162 = arith.select %10, %160, %161 : vector<8x128xi1>, vector<8x128xf32>
    %163 = arith.addf %3, %162 : vector<8x128xf32>
    %c1_i32_71 = arith.constant 1 : i32
    %cst_72 = arith.constant 0.000000e+00 : f32
    %164 = vector.broadcast %cst_72 : f32 to vector<8x128xf32>
    %165 = vector.shape_cast %163 : vector<8x128xf32> to vector<1x8x128xf32>
    %cst_73 = arith.constant dense<0.000000e+00> : vector<1xf32>
    %166 = vector.multi_reduction <add>, %165, %cst_73 [1, 2] : vector<1x8x128xf32> to vector<1xf32>
    %167 = vector.shape_cast %166 : vector<1xf32> to vector<1x1x1xf32>
    %168 = vector.extract %167[0, 0, 0] : f32 from vector<1x1x1xf32>
    %169 = vector.broadcast %168 : f32 to vector<8x128xf32>
    %170 = arith.addf %164, %169 : vector<8x128xf32>
    %c0_74 = arith.constant 0 : index
    %c0_75 = arith.constant 0 : index
    %c0_76 = arith.constant 0 : index
    %c0_77 = arith.constant 0 : index
    %171 = vector.load %arg5[%c0_74, %c0_75, %c0_76, %c0_77] : memref<1x1x8x128xf32, #tpu.memory_space<vmem>>, vector<1x1x8x128xf32>
    %172 = vector.shape_cast %171 : vector<1x1x8x128xf32> to vector<8x128xf32>
    %173 = vector.shape_cast %170 : vector<8x128xf32> to vector<1x1x8x128xf32>
    tpu.vector_store %arg5[%c0_74, %c0_75, %c0_76, %c0_77], %173 {strides = array<i32>} : memref<1x1x8x128xf32, #tpu.memory_space<vmem>>, vector<1x1x8x128xf32>,
    return
  }
  func.func @transform_0(%arg0: i32, %arg1: i32, %arg2: memref<3xf32, #tpu.memory_space<smem>>) -> (i32, i32, i32, i32, i32) {
    %c0_i32 = arith.constant 0 : i32
    %c0_i32_0 = arith.constant 0 : i32
    %c0_i32_1 = arith.constant 0 : i32
    %c0_i32_2 = arith.constant 0 : i32
    return %c0_i32, %arg0, %c0_i32_0, %arg1, %c0_i32_1 : i32, i32, i32, i32, i32
  }
  func.func @transform_1(%arg0: i32, %arg1: i32, %arg2: memref<3xf32, #tpu.memory_space<smem>>) -> (i32, i32, i32) {
    %c0_i32 = arith.constant 0 : i32
    %c0_i32_0 = arith.constant 0 : i32
    return %arg0, %arg1, %c0_i32 : i32, i32, i32
  }
  func.func @transform_2(%arg0: i32, %arg1: i32, %arg2: memref<3xf32, #tpu.memory_space<smem>>) -> (i32, i32, i32, i32) {
    %c0_i32 = arith.constant 0 : i32
    %c0_i32_0 = arith.constant 0 : i32
    %c0_i32_1 = arith.constant 0 : i32
    return %arg0, %arg1, %c0_i32, %c0_i32_0 : i32, i32, i32, i32
  }
}

</mosaic_0001>

<bundles_post_ra>
// kernel: tpu_custom_call.1
= control target key start
LH: loop header
LB: loop body
LE: loop exit
PB: predicated region body
PF: predicated region fallthrough
CT: control target
= control target key end

     0   :  { %s1164_s0 = inlined_call_operand.hbm [shape: f32[3], index: 0, kind: input, shape index: {}]   ;;  %s1165_s1 = inlined_call_operand.hbm [shape: f32[3,2,4,8,128], index: 1, kind: input, shape index: {}]   ;;  %s1166_s2 = inlined_call_operand.hbm [shape: s32[2,8,128], index: 2, kind: input, shape index: {}]   ;;  %s1167_s3 = inlined_call_operand.hbm [shape: f32[2,1,8,128], index: 3, kind: output, shape index: {}]  }
   0x1   :  { %s677_s14 = scalar_lea.hbm %s1164_s0, 16 }
   0x2   :  { %p678_p0 = scmp.ne.s32.totalorder %s1164_s0, %s677_s14  ;;  %p681_p1 = scmp.lt.u32.totalorder %s677_s14, %s1164_s0 }
   0x4   :  { %p683_p2 = pnand %p681_p1, %p678_p0 }
   0x6   :  { %686 = shalt.err (!%p683_p2)  }
   0x7   :  { %s805_s19 = smov [#allocation3]  }
   0x8   :  { %9 = dma.hbm_to_smem %s1164_s0, 16, %s805_s19, [#allocation2] }
   0x9   :  { %767 = dma.done.wait [#allocation2], 16 }
   0xa   :  { %768 = vsyncadd [#allocation2], 4294967280 }
   0xb   :  { %11 = sfence }
   0xc   :  { %12 = vsyncpa [#allocation5], 0 }
   0xd   :  { %14 = vsyncpa [#allocation5 + $0x1], 0 }
   0xe   :  { %15 = vsyncpa [#allocation8], 0 }
   0xf   :  { %17 = vsyncpa [#allocation8 + $0x1], 0 }
  0x10   :  { %18 = vsyncpa [#allocation6], 0 }
  0x11   :  { %20 = vsyncpa [#allocation6 + $0x1], 0  ;;  %s846_s22 = smov 0   ;;  %s848_s23 = smov 0  }
  0x12   :  { %s850_s24 = smov 0   ;;  %s852_s25 = smov 0  }
  0x13   :  { %s854_s26 = smov 0   ;;  %s856_s0 = smov 0  }
  0x14 LB: > { %s539_s27 = sadd.s32 4294967295, %s803_s0   ;;  %s540_s28 = sadd.s32 4294967294, %s803_s0   ;;  %s803_s0 = sphi %s856_s0, %s26_s0   ;;  %s799_s26 = sphi %s854_s26, %s1183_s26   ;;  %s795_s25 = sphi %s852_s25, %s1182_s25   ;;  %s791_s24 = sphi %s850_s24, %s1181_s24   ;;  %s787_s23 = sphi %s848_s23, %s1180_s23   ;;  %s783_s22 = sphi %s846_s22, %s1179_s22  }
  0x15   : > { %s38_s29 = sadd.s32 1, %s799_s26  ;;  %s47_s30 = sadd.s32 1, %s791_s24 }
  0x16   : > { %p40_p3 = scmp.ge.s32.totalorder %s38_s29, 2  ;;  %p54_p4 = scmp.ne.s32.totalorder %s791_s24, %s787_s23 }
  0x17   : > { %p55_p5 = scmp.eq.s32.totalorder %s803_s0, 0  ;;  %p60_p6 = scmp.ne.s32.totalorder %s787_s23, %s783_s22 }
  0x18   : > { %s1185_s29 = smov (%p40_p3, %s38_s29), 0  ;;  %p61_p8 = scmp.eq.s32.totalorder %s539_s27, 0 }
  0x19   : > { %p887_p7 = por %p55_p5, %p54_p4  ;;  %s42_s5 = ssub.s32 %s799_s26, %s1185_s29 }
  0x1a   : > { %p114_p9 = scmp.eq.s32.totalorder %s539_s27, 1  ;;  %p45_p10 = scmp.eq.s32.totalorder %s42_s5, 0 }
  0x1b   : > { %p893_p11 = por %p61_p8, %p60_p6  ;;  %p120_p13 = scmp.eq.s32.totalorder %s540_s28, 1 }
  0x1c   : > { %p897_p12 = por %p114_p9, %p54_p4  ;;  %p1168_p1 = scmp.ge.s32.totalorder %s803_s0, 2 }
  0x1d   : > { %s1172_s6 = scalar_select %p893_p11, 1, 0 }
  0x1e   : > { %s1173_s7 = scalar_select %p897_p12, 1, 0 }
  0x1f   : > { %s902_s8 = scalar_select %p45_p10, %s791_s24, %s47_s30  }
  0x20   : > { %p904_p0 = por %p120_p13, %p60_p6  ;;  %136 = sbr.rel (%p1168_p1) target bundleno = 77 (0x4d), region = 16 }
  0x22   : > { %s1174_s9 = scalar_select %p904_p0, 1, 0 }
  0x27   : > { %s912_s10 = sand.u32 1, %s791_s24   ;;  %s569_s12 = sshll.u32 %s799_s26, 9 }
  0x28   : > { %s570_s11 = smul.u32 96, %s912_s10  ;;  %s806_s13 = smov 1024  }
  0x29   : > { %575 = sst [smem:[#allocation11]] (%p887_p7), %s806_s13  ;;  %s151_s17 = scalar_lea.hbm %s1165_s1, %s569_s12 }
  0x2a   : > { %s574_s14 = scalar_select %p887_p7, [#allocation0], [#allocation12] }
  0x2b   : > { %s144_s19 = scalar_lea.vmem [#allocation4], %s570_s11  ;;  %s807_s21 = smov 512  }
  0x2c   : > { %s156_s18 = sld [smem:[%s574_s14]]   ;;  %s164_s20 = sshll.u32 %s144_s19, 4  ;;  %s165_s20 = int_to_ptr.vmem [resolvable:$true] %s164_s20 }
  0x2d   : > { %576 = sst [smem:[#allocation11 + $0x1]] (%p887_p7), %s807_s21  ;;  %s808_s27 = smov 4  }
  0x2e   : > { %577 = sst [smem:[#allocation11 + $0x2]] (%p887_p7), %s808_s27  ;;  %s809_s28 = smov 128  }
  0x2f   : > { %578 = sst [smem:[#allocation11 + $0x3]] (%p887_p7), %s809_s28  ;;  %s810_s30 = smov 8  }
  0x30   : > { %579 = sst [smem:[#allocation11 + $0x4]] (%p887_p7), %s809_s28  ;;  %s141_s11 = scalar_lea.sflag [#allocation5], %s912_s10 }
  0x31   : > { %580 = sst [smem:[#allocation11 + $0x5]] (%p887_p7), %s810_s30  ;;  %s811_s13 = smov [#allocation10]  }
  0x32   : > { %s545_s5 = sshll.u32 %s156_s18, 26  ;;  %s547_s14 = sshll.u32 %s912_s10, 3 }
  0x33   : > { %s546_s12 = sadd.s32 134217728, %s545_s5  ;;  %s548_s15 = sshll.u32 %s799_s26, 7 }
  0x34   : > { %581 = dma.general (%p887_p7), %s151_s17, 1536, %s165_s20, %s141_s11, %s811_s13, [#allocation11], %s546_s12, 0  }
  0x35   : > { %s941_s21 = scalar_lea.hbm %s1166_s2, %s548_s15  ;;  %s191_s18 = scalar_lea.vmem [#allocation7], %s547_s14 }
  0x36   : > { %s199_s27 = sshll.u32 %s191_s18, 4  ;;  %s188_s28 = scalar_lea.sflag [#allocation8], %s912_s10  ;;  %s200_s27 = int_to_ptr.vmem [resolvable:$true] %s199_s27 }
  0x37   : > { %s687_s17 = scalar_lea.hbm %s941_s21, 128  ;;  %s691_s5 = scalar_lea.hbm %s1166_s2, 256 }
  0x38   : > { %p688_p2 = scmp.ne.s32.totalorder %s941_s21, %s687_s17  ;;  %p692_p5 = scmp.lt.u32.totalorder %s941_s21, %s1166_s2 }
  0x39   : > { %p693_p6 = scmp.lt.u32.totalorder %s691_s5, %s687_s17  ;;  %p695_p9 = scmp.lt.u32.totalorder %s687_s17, %s941_s21 }
  0x3a   : > { %p689_p3 = pnand %p688_p2, %p887_p7 }
  0x3b   : > { %p694_p8 = por %p693_p6, %p692_p5 }
  0x3c   : > { %p690_p4 = pneg %p689_p3 }
  0x3d   : > { %p696_p10 = por %p695_p9, %p694_p8 }
  0x3f   : > { %p697_p13 = pnand %p696_p10, %p690_p4 }
  0x41   : > { %700 = shalt.err (!%p697_p13)
}
  0x42   : > { %s701_s10 = scalar_lea.vmem %s200_s27, 128  ;;  %s812_s13 = smov [#allocation7]  }
  0x43   : > { %p702_p1 = scmp.ne.s32.totalorder %s200_s27, %s701_s10  ;;  %s705_s14 = sshll.u32 %s812_s13, 4  ;;  %s706_s14 = int_to_ptr.vmem [resolvable:$false] %s705_s14 }
  0x44   : > { %s707_s15 = scalar_lea.vmem %s706_s14, 256  ;;  %p708_p0 = scmp.lt.s32.totalorder %s200_s27, %s706_s14 }
  0x45   : > { %p703_p2 = pnand %p702_p1, %p887_p7  ;;  %p709_p12 = scmp.lt.s32.totalorder %s707_s15, %s701_s10 }
  0x47   : > { %p704_p3 = pneg %p703_p2  ;;  %p710_p11 = por %p709_p12, %p708_p0 }
  0x49   : > { %p711_p5 = pnand %p710_p11, %p704_p3 }
  0x4b   : > { %714 = shalt.err (!%p711_p5)
}
  0x4c   : > { %582 = dma.hbm_to_vmem [thread:$0]  (%p887_p7), %s941_s21, 128, %s200_s27, %s188_s28  }
  0x4d PF: > { %p549_p4 = scmp.ge.s32.totalorder %s803_s0, 1  ;;  %p204_p6 = scmp.lt.s32.totalorder %s803_s0, 3 }
  0x4f   : > { %p205_p1 = pnand %p549_p4, %p204_p6 }
  0x50   : > { %s964_s16 = sand.u32 (!%p205_p1), 1, %s787_s23   ;;  %p1175_p11 = scmp.ne.s32.totalorder (!%p205_p1), %s1172_s6, 0 }
  0x51   : > { %208 = sbr.rel (%p205_p1) target bundleno = 370 (0x172), region = 28  ;;  %s211_s18 = scalar_lea.sflag (!%p205_p1), [#allocation5], %s964_s16 }
  0x52   : > { %s571_s19 = smul.u32 (!%p205_p1), 96, %s964_s16 }
  0x54   : > { %s968_s17 = scalar_lea.vmem (!%p205_p1), [#allocation4], %s571_s19 }
  0x58   : > { %770 = dma.done.wait (%p1175_p11), %s211_s18, 1536  }
  0x59   : > { %772 = vsyncadd (%p1175_p11), %s211_s18, 4294965760  ;;  %s550_s4 = sshll.u32 %s964_s16, 3  ;;  %s220_s21 = scalar_lea.sflag [#allocation8], %s964_s16 }
  0x5a   : > { %s978_s27 = scalar_lea.vmem [#allocation7], %s550_s4 }
  0x5b   : > { %774 = dma.done.wait (%p1175_p11), %s220_s21, 128  }
  0x5c   : > { %776 = vsyncadd (%p1175_p11), %s220_s21, 4294967168  ;;  %v985_v0 = vld [vmem:[%s968_s17] sm:$0xff]  ;;  %v988_v1 = vld [vmem:[%s968_s17 + $0x8] sm:$0xff]  ;;  %s249_s6 = sld [smem:[#allocation3]]  ;;  %s552_s28 = sld [smem:[#allocation3 + $0x1]] }
  0x5d   : > { %v991_v2 = vld [vmem:[%s968_s17 + $0x10] sm:$0xff]  ;;  %v268_v3 = vmax.f32 %v985_v0, %v988_v1  ;;  %v996_v4 = vld [vmem:[%s968_s17 + $0x20] sm:$0xff]  ;;  %v999_v5 = vld [vmem:[%s968_s17 + $0x28] sm:$0xff]  ;;  %s553_s20 = sld [smem:[#allocation3 + $0x2]]  ;;  %s248_s30 = scalar_lea.vmem [#allocation9], %s550_s4 }
  0x5e   : > { %v1002_v6 = vld [vmem:[%s968_s17 + $0x30] sm:$0xff]  ;;  %v1005_v7 = vld [vmem:[%s968_s17 + $0x18] sm:$0xff]  ;;  %v314_v8 = vmax.f32 %v996_v4, %v999_v5  ;;  %v1014_v11 = vld [vmem:[%s968_s17 + $0x40] sm:$0xff]  ;;  %s423_s5 = sshll.u32 %s248_s30, 4  ;;  %s566_s12 = sshll.u32 %s795_s25, 7  ;;  %s1112_s5 = int_to_ptr.vmem [resolvable:$true] %s423_s5 }
  0x5f   : > { %v269_v9 = vmax.f32 %v268_v3, %v991_v2  ;;  %v1011_v10 = vld [vmem:[%s968_s17 + $0x38] sm:$0xff]  ;;  %v1017_v12 = vld [vmem:[%s968_s17 + $0x48] sm:$0xff]  ;;  %v1037_v21 = vld [vmem:[%s968_s17 + $0x50] sm:$0xff]  ;;  %s1117_s14 = scalar_lea.hbm %s1167_s3, %s566_s12  ;;  %s409_s15 = scalar_lea.sflag [#allocation6], %s964_s16 }
  0x60   : > { %v315_v13 = vmax.f32 %v314_v8, %v1002_v6  ;;  %v360_v16 = vmax.f32 %v1014_v11, %v1017_v12  ;;  %v1046_v25 = vld [vmem:[%s968_s17 + $0x58] sm:$0xff]  ;;  %v1063_v48 = vld [vmem:[%s978_s27] sm:$0xff]  ;;  %s715_s19 = scalar_lea.vmem %s1112_s5, 128  ;;  %p1176_p12 = scmp.ne.s32.totalorder %s1173_s7, 0 }
  0x61   : > { %v1021_v14 = vmax.f32 %v269_v9, %v1005_v7  ;;  %vm254_vm0 = vcmp.eq.s32.totalorder %v1063_v48, 0  ;;  %vm255_vm1 = vcmp.eq.s32.totalorder %v1063_v48, 1  ;;  %vm256_vm2 = vcmp.eq.s32.totalorder %v1063_v48, 2  ;;  %p716_p7 = scmp.ne.s32.totalorder %s1112_s5, %s715_s19  ;;  %s813_s25 = smov [#allocation9]  }
  0x62   : > { %v1024_v15 = vmax.f32 %v315_v13, %v1011_v10  ;;  %v361_v31 = vmax.f32 %v360_v16, %v1037_v21  ;;  %v275_v59 = vsel %vm254_vm0, %v985_v0, 0.0  ;;  %v281_v60 = vsel %vm255_vm1, %v988_v1, 0.0  ;;  %s719_s18 = sshll.u32 %s813_s25, 4  ;;  %s720_s18 = int_to_ptr.vmem [resolvable:$false] %s719_s18 }
  0x63   : > { %v271_v17 = vsub.f32 %v985_v0, %v1021_v14  ;;  %v277_v18 = vsub.f32 %v988_v1, %v1021_v14  ;;  %v283_v19 = vsub.f32 %v991_v2, %v1021_v14  ;;  %v289_v20 = vsub.f32 %v1005_v7, %v1021_v14  ;;  %p717_p0 = pnand %p716_p7, %p1176_p12  ;;  %s721_s17 = scalar_lea.vmem %s720_s18, 256 }
  0x64   : > { %v317_v22 = vsub.f32 %v996_v4, %v1024_v15  ;;  %v323_v23 = vsub.f32 %v999_v5, %v1024_v15  ;;  %v329_v24 = vsub.f32 %v1002_v6, %v1024_v15  ;;  %v335_v29 = vsub.f32 %v1011_v10, %v1024_v15  ;;  %p722_p9 = scmp.lt.s32.totalorder %s1112_s5, %s720_s18  ;;  %p723_p10 = scmp.lt.s32.totalorder %s721_s17, %s715_s19 }
  0x65   : > { %v272_v26 = vmul.f32 1.442695, %v271_v17  ;;  %v278_v27 = vmul.f32 1.442695, %v277_v18  ;;  %v284_v28 = vmul.f32 1.442695, %v283_v19  ;;  %v1052_v34 = vmax.f32 %v361_v31, %v1046_v25  ;;  %p718_p8 = pneg %p717_p0 }
  0x66   : > { %v290_v30 = vmul.f32 1.442695, %v289_v20  ;;  %v318_v32 = vmul.f32 1.442695, %v317_v22  ;;  %v324_v33 = vmul.f32 1.442695, %v323_v23  ;;  %v282_v13 = vadd.f32 %v281_v60, %v275_v59  ;;  %p724_p13 = por %p723_p10, %p722_p9 }
  0x67   : > { %647 = vpow2.f32 %v272_v26  ;;  %v330_v35 = vmul.f32 1.442695, %v329_v24  ;;  %v336_v36 = vmul.f32 1.442695, %v335_v29  ;;  %v363_v37 = vsub.f32 %v1014_v11, %v1052_v34 }
  0x68   : > { %649 = vpow2.f32 %v278_v27  ;;  %v369_v38 = vsub.f32 %v1017_v12, %v1052_v34  ;;  %v375_v39 = vsub.f32 %v1037_v21, %v1052_v34  ;;  %v381_v40 = vsub.f32 %v1046_v25, %v1052_v34  ;;  %p725_p2 = pnand %p724_p13, %p718_p8 }
  0x69   : > { %651 = vpow2.f32 %v284_v28  ;;  %v364_v41 = vmul.f32 1.442695, %v363_v37  ;;  %vm257_vm3 = vcmp.eq.s32.totalorder %v1063_v48, 3  ;;  %v287_v16 = vsel %vm256_vm2, %v991_v2, 0.0 }
  0x6a   : > { %653 = vpow2.f32 %v290_v30  ;;  %v370_v42 = vmul.f32 1.442695, %v369_v38  ;;  %v376_v43 = vmul.f32 1.442695, %v375_v39  ;;  %v382_v44 = vmul.f32 1.442695, %v381_v40 }
  0x6b   : > { %655 = vpow2.f32 %v318_v32  ;;  %v321_v0 = vsel %vm254_vm0, %v996_v4, 0.0  ;;  %v327_v1 = vsel %vm255_vm1, %v999_v5, 0.0  ;;  %v288_v19 = vadd.f32 %v287_v16, %v282_v13 }
  0x6c   : > { %657 = vpow2.f32 %v324_v33  ;;  %v293_v20 = vsel %vm257_vm3, %v1005_v7, 0.0  ;;  %v328_v22 = vadd.f32 %v327_v1, %v321_v0  ;;  %v333_v2 = vsel %vm256_vm2, %v1002_v6, 0.0 }
  0x6d   : > { %659 = vpow2.f32 %v330_v35  ;;  %v367_v4 = vsel %vm254_vm0, %v1014_v11, 0.0  ;;  %v373_v5 = vsel %vm255_vm1, %v1017_v12, 0.0  ;;  %v294_v24 = vadd.f32 %v293_v20, %v288_v19 }
  0x6e   : > { %661 = vpow2.f32 %v336_v36  ;;  %v334_v7 = vadd.f32 %v333_v2, %v328_v22  ;;  %v374_v27 = vadd.f32 %v373_v5, %v367_v4  ;;  %v339_v28 = vsel %vm257_vm3, %v1011_v10, 0.0 }
  0x6f   : > { %663 = vpow2.f32 %v364_v41  ;;  %v379_v6 = vsel %vm256_vm2, %v1037_v21, 0.0  ;;  %v299_v33 = vstv %s249_s6  ;;  %v385_v35 = vsel %vm257_vm3, %v1046_v25, 0.0 }
  0x70   : > { %665 = vpow2.f32 %v370_v42  ;;  %v340_v30 = vadd.f32 %v339_v28, %v334_v7  ;;  %v380_v32 = vadd.f32 %v379_v6, %v374_v27  ;;  %v345_v37 = vstv %s552_s28 }
  0x71   : > { %v648_v45 = vpop.eup %647  ;;  %667 = vpow2.f32 %v376_v43  ;;  %v391_v42 = vstv %s553_s20  ;;  %vm253_vm4 = vcmp.ge.s32.totalorder %v1063_v48, 0 }
  0x72   : > { %v650_v46 = vpop.eup %649  ;;  %669 = vpow2.f32 %v382_v44  ;;  %v386_v21 = vadd.f32 %v385_v35, %v380_v32 }
  0x73   : > { %v652_v47 = vpop.eup %651  ;;  %v280_v49 = vadd.f32 %v650_v46, %v648_v45 }
  0x74   : > { %v654_v50 = vpop.eup %653 }
  0x75   : > { %v656_v51 = vpop.eup %655  ;;  %v286_v52 = vadd.f32 %v652_v47, %v280_v49 }
  0x76   : > { %v658_v53 = vpop.eup %657 }
  0x77   : > { %v660_v54 = vpop.eup %659  ;;  %v292_v55 = vadd.f32 %v654_v50, %v286_v52  ;;  %v326_v56 = vadd.f32 %v658_v53, %v656_v51 }
  0x78   : > { %v662_v57 = vpop.eup %661 }
  0x79   : > { %v664_v58 = vpop.eup %663  ;;  %671 = vlog2.f32 %v292_v55  ;;  %v332_v61 = vadd.f32 %v660_v54, %v326_v56 }
  0x7a   : > { %v666_v62 = vpop.eup %665 }
  0x7b   : > { %v668_v63 = vpop.eup %667  ;;  %v338_v3 = vadd.f32 %v662_v57, %v332_v61  ;;  %v372_v8 = vadd.f32 %v666_v62, %v664_v58 }
  0x7c   : > { %v670_v9 = vpop.eup %669 }
  0x7d   : > { %673 = vlog2.f32 %v338_v3  ;;  %v378_v17 = vadd.f32 %v668_v63, %v372_v8 }
  0x7f   : > { %v384_v18 = vadd.f32 %v670_v9, %v378_v17 }
  0x81   : > { %675 = vlog2.f32 %v384_v18 }
  0x83   : > { %v672_v23 = vpop.eup %671 }
  0x84   : > { %v296_v26 = vmul.f32 0.6931472, %v672_v23 }
  0x86   : > { %v297_v11 = vadd.f32 %v296_v26, %v1021_v14 }
  0x87   : > { %v674_v29 = vpop.eup %673 }
  0x88   : > { %v298_v12 = vsub.f32 %v297_v11, %v294_v24  ;;  %v342_v31 = vmul.f32 0.6931472, %v674_v29 }
  0x8a   : > { %v343_v36 = vadd.f32 %v342_v31, %v1024_v15  ;;  %v300_v38 = vmul.f32 %v299_v33, %v298_v12 }
  0x8b   : > { %v676_v10 = vpop.eup %675 }
  0x8c   : > { %v344_v39 = vsub.f32 %v343_v36, %v340_v30  ;;  %v388_v40 = vmul.f32 0.6931472, %v676_v10 }
  0x8e   : > { %v346_v14 = vmul.f32 %v345_v37, %v344_v39  ;;  %v389_v41 = vadd.f32 %v388_v40, %v1052_v34 }
  0x90   : > { %v347_v43 = vadd.f32 %v346_v14, %v300_v38  ;;  %v390_v44 = vsub.f32 %v389_v41, %v386_v21 }
  0x92   : > { %v392_v45 = vmul.f32 %v391_v42, %v390_v44 }
  0x94   : > { %v393_v25 = vadd.f32 %v392_v45, %v347_v43 }
  0x96   : > { %v394_v46 = vsel %vm253_vm4, %v393_v25, 0.0 }
  0x97   : > { %396 = vadd.xlane.f32.xlu0 %v394_v46 }
 0x124   : > { %v397_v15 = vpop.xlane.xlu0 %396 }
 0x125   : > { %v398_v47 = vrot.slane %v397_v15, 4 }
 0x127   : > { %v399_v49 = vadd.f32 %v398_v47, %v397_v15 }
 0x129   : > { %v400_v50 = vrot.slane %v399_v49, 2 }
 0x12b   : > { %v401_v51 = vadd.f32 %v400_v50, %v399_v49 }
 0x12d   : > { %v402_v52 = vrot.slane %v401_v51, 1 }
 0x12f   : > { %v403_v34 = vadd.f32 %v402_v52, %v401_v51 }
 0x131   : > { %572 = vpush %v403_v34 }
 0x162   : > { %s573_s11 = spop %572 }
 0x163   : > { %v405_v48 = vstv %s573_s11 }
 0x164   : > { %407 = vst [vmem:[%s248_s30] sm:$0xff] %v405_v48 }
 0x165   : > { %728 = shalt.err (!%p725_p2)
}
 0x166   : > { %s729_s16 = scalar_lea.hbm %s1117_s14, 128  ;;  %s733_s27 = scalar_lea.hbm %s1167_s3, 256 }
 0x167   : > { %p730_p3 = scmp.ne.s32.totalorder %s1117_s14, %s729_s16  ;;  %p734_p6 = scmp.lt.u32.totalorder %s1117_s14, %s1167_s3 }
 0x168   : > { %p735_p1 = scmp.lt.u32.totalorder %s733_s27, %s729_s16  ;;  %p737_p7 = scmp.lt.u32.totalorder %s729_s16, %s1117_s14 }
 0x169   : > { %p731_p5 = pnand %p730_p3, %p1176_p12 }
 0x16a   : > { %p736_p11 = por %p735_p1, %p734_p6 }
 0x16b   : > { %p732_p4 = pneg %p731_p5 }
 0x16c   : > { %p738_p0 = por %p737_p7, %p736_p11 }
 0x16e   : > { %p739_p8 = pnand %p738_p0, %p732_p4 }
 0x170   : > { %742 = shalt.err (!%p739_p8)
}
 0x171   : > { %585 = dma.vmem_to_hbm [thread:$0]  (%p1176_p12), %s1112_s5, 128, %s1117_s14, %s409_s15  }
 0x172 PF: > { %s435_s20 = sand.u32 1, %s783_s22   ;;  %p1177_p9 = scmp.ne.s32.totalorder %s1174_s9, 0 }
 0x173   : > { %p1178_p10 = scmp.ge.s32.totalorder %s803_s0, 2  ;;  %s436_s30 = scalar_lea.sflag [#allocation6], %s435_s20 }
 0x175   : > { %p588_p13 = pnand %p1178_p10, %p1177_p9 }
 0x177   : > { %778 = dma.done.wait (!%p588_p13), %s436_s30, 128  }
 0x178   : > { %780 = vsyncadd (!%p588_p13), %s436_s30, 4294967168  ;;  %s26_s0 = sadd.s32 1, %s803_s0   ;;  %s1179_s22 = smov %s787_s23 }
 0x179   : > { %p23_p2 = scmp.ge.s32.totalorder %s26_s0, 4   ;;  %s1180_s23 = smov %s791_s24 }
 0x17a   : > { %s1181_s24 = smov %s902_s8  ;;  %s1182_s25 = smov %s799_s26 }
 0x17b   : > { %s1183_s26 = smov %s1185_s29  ;;  %25 = sbr.rel (!%p23_p2) target bundleno = 20 (0x14), region = 102 }
 0x182   :  { %441 = vsyncpa [#allocation5], 1 }
 0x183   :  { %443 = vsyncpa [#allocation5 + $0x1], 1 }
 0x184   :  { %444 = vsyncpa [#allocation8], 1 }
 0x185   :  { %446 = vsyncpa [#allocation8 + $0x1], 1 }
 0x186   :  { %447 = vsyncpa [#allocation6], 1 }
 0x187   :  { %449 = vsyncpa [#allocation6 + $0x1], 1 }

</bundles_post_ra>
